<compile_context>
chip_gen: v5e
topology: v5e:2x2
jax: 0.10.0
libtpu: 0.0.40
codegen_flags: <defaults>
</compile_context>

<pallas_src>
import functools
import inspect

import jax
import jax.numpy as jnp
from jax.experimental import pallas as pl
from jax.experimental.pallas import tpu as pltpu

LANE = 128


def _round_up(x, m):
    return ((x + m - 1) // m) * m


def _supports_pipeline_mode():
    if not hasattr(pl, "Buffered"):
        return False
    try:
        return "pipeline_mode" in inspect.signature(pl.BlockSpec).parameters
    except (TypeError, ValueError):
        return True


_HAS_BUFFERED = _supports_pipeline_mode()


def _resident_spec(block_shape):
    """VMEM-resident operand: constant index_map; single-buffered where supported."""
    nd = len(block_shape)
    index_map = lambda i: (0,) * nd
    if _HAS_BUFFERED:
        return pl.BlockSpec(block_shape, index_map, pipeline_mode=pl.Buffered(1))
    return pl.BlockSpec(block_shape, index_map)


def _vmem_budget():
    """(usable_budget_bytes, vmem_limit_bytes) per TPU generation."""
    cap = 64 * 1024 * 1024  # conservative default = v7x per-TensorCore VMEM
    try:
        info = pltpu.get_tpu_info()
        cap = int(getattr(info, "vmem_capacity_bytes", cap)) or cap
    except Exception:
        pass
    cap = max(cap, 32 * 1024 * 1024)
    limit = min(cap - 8 * 1024 * 1024, 112 * 1024 * 1024)   # ~56 MiB v7x, ~112 MiB v5e/v6e
    budget = limit - 4 * 1024 * 1024
    return budget, limit


def _choose_tm(n, f_max, budget):
    """Largest 128-multiple row stripe whose total VMEM footprint fits the budget.

    Footprint = resident S + W + b (single-buffered) + double-buffered adj stripe
    + double-buffered output stripe."""
    cap = _round_up(n, LANE)
    for tm in (512, 256, 128):
        if tm > cap:
            continue
        n_pad = _round_up(n, tm)
        resident = n_pad * f_max * 2 + f_max * f_max * 2 + f_max * 4
        if not _HAS_BUFFERED:
            resident *= 2  # pipeline still double-buffers constant-index operands
        streamed = 2 * tm * n_pad * 2 + 2 * tm * f_max * 4
        if resident + streamed <= budget:
            return tm
    return LANE


# ---------------- kernels ----------------

def _transform_kernel(x_ref, w_ref, s_ref):
    # S = X @ W   (bf16 in, f32 MXU accumulation, bf16 out)
    s_ref[...] = jnp.dot(x_ref[...], w_ref[...],
                         preferred_element_type=jnp.float32).astype(s_ref.dtype)


def _fused_agg_transform_kernel(adj_ref, s_ref, b_ref, w_next_ref, s_next_ref):
    # H_rows = relu(adj_rows @ S + b);  S_next_rows = H_rows @ W_next
    # (dropout between layers is the identity at inference)
    h = jnp.dot(adj_ref[...], s_ref[...],
                preferred_element_type=jnp.float32) + b_ref[...]
    h = jnp.maximum(h, 0.0)
    s_next_ref[...] = jnp.dot(h.astype(w_next_ref.dtype), w_next_ref[...],
                              preferred_element_type=jnp.float32).astype(s_next_ref.dtype)


def _final_agg_logsoftmax_kernel(adj_ref, s_ref, b_ref, o_ref, *, nclass):
    h = jnp.dot(adj_ref[...], s_ref[...],
                preferred_element_type=jnp.float32) + b_ref[...]
    # mask zero-padded class lanes before the row reductions so lse stays correct
    lane = jax.lax.broadcasted_iota(jnp.int32, h.shape, dimension=1)
    h = jnp.where(lane < nclass, h, -1e30)
    m = jnp.max(h, axis=1, keepdims=True)
    z = h - m
    lse = jnp.log(jnp.sum(jnp.exp(z), axis=1, keepdims=True))
    o_ref[...] = (z - lse).astype(o_ref.dtype)


# ---------------- pallas_call wrappers ----------------

def _transform(x, w, tm, vmem_limit):
    n, f_in = x.shape
    f_out = w.shape[1]
    return pl.pallas_call(
        _transform_kernel,
        out_shape=jax.ShapeDtypeStruct((n, f_out), jnp.bfloat16),
        grid_spec=pltpu.PrefetchScalarGridSpec(
            num_scalar_prefetch=0,
            grid=(n // tm,),
            in_specs=[pl.BlockSpec((tm, f_in), lambda i: (i, 0)),   # streamed rows of x
                      _resident_spec((f_in, f_out))],               # W resident
            out_specs=pl.BlockSpec((tm, f_out), lambda i: (i, 0))),
        compiler_params=pltpu.CompilerParams(
            dimension_semantics=("parallel",),
            vmem_limit_bytes=vmem_limit),
        cost_estimate=pl.CostEstimate(
            flops=2 * n * f_in * f_out,
            transcendentals=0,
            bytes_accessed=2 * (n * f_in + f_in * f_out + n * f_out)),
    )(x, w)


def _fused_layer(adj, s, b, w_next, tm, vmem_limit):
    n = adj.shape[0]
    f_out = s.shape[1]
    f_next = w_next.shape[1]
    return pl.pallas_call(
        _fused_agg_transform_kernel,
        out_shape=jax.ShapeDtypeStruct((n, f_next), jnp.bfloat16),
        grid_spec=pltpu.PrefetchScalarGridSpec(
            num_scalar_prefetch=0,
            grid=(n // tm,),
            in_specs=[pl.BlockSpec((tm, n), lambda i: (i, 0)),   # adj row stripe (streamed)
                      _resident_spec((n, f_out)),                # S resident
                      _resident_spec((1, f_out)),                # bias resident
                      _resident_spec((f_out, f_next))],          # W_next resident
            out_specs=pl.BlockSpec((tm, f_next), lambda i: (i, 0))),
        compiler_params=pltpu.CompilerParams(
            dimension_semantics=("parallel",),
            vmem_limit_bytes=vmem_limit),
        cost_estimate=pl.CostEstimate(
            flops=2 * n * n * f_out + 2 * n * f_out * f_next,
            transcendentals=0,
            bytes_accessed=2 * n * n + 2 * n * f_out + 4 * f_out
                           + 2 * f_out * f_next + 2 * n * f_next),
    )(adj, s, b, w_next)


def _final_layer(adj, s, b, nclass, tm, vmem_limit):
    n = adj.shape[0]
    f_out = s.shape[1]
    kernel = functools.partial(_final_agg_logsoftmax_kernel, nclass=nclass)
    return pl.pallas_call(
        kernel,
        out_shape=jax.ShapeDtypeStruct((n, f_out), jnp.float32),
        grid_spec=pltpu.PrefetchScalarGridSpec(
            num_scalar_prefetch=0,
            grid=(n // tm,),
            in_specs=[pl.BlockSpec((tm, n), lambda i: (i, 0)),   # adj row stripe (streamed)
                      _resident_spec((n, f_out)),                # S resident
                      _resident_spec((1, f_out))],               # bias resident
            out_specs=pl.BlockSpec((tm, f_out), lambda i: (i, 0))),
        compiler_params=pltpu.CompilerParams(
            dimension_semantics=("parallel",),
            vmem_limit_bytes=vmem_limit),
        cost_estimate=pl.CostEstimate(
            flops=2 * n * n * f_out,
            transcendentals=n * f_out,
            bytes_accessed=2 * n * n + 2 * n * f_out + 4 * f_out + 4 * n * f_out),
    )(adj, s, b)


# ---------------- forward ----------------

def gnn_three_hop(x, adj, params):
    """Eval-mode forward of the 3-hop GCN; params = (w1,b1,w2,b2,w3,b3), biases [1,F]."""
    w1, b1, w2, b2, w3, b3 = params
    n = x.shape[0]
    nclass = w3.shape[1]

    f0p = _round_up(x.shape[1], LANE)
    f1p = _round_up(w1.shape[1], LANE)
    f2p = _round_up(w2.shape[1], LANE)
    f3p = _round_up(w3.shape[1], LANE)
    f_max = max(f0p, f1p, f2p, f3p)

    budget, vmem_limit = _vmem_budget()
    tm = _choose_tm(n, f_max, budget)
    n_pad = _round_up(n, tm)   # tm is a multiple of 128 -> n_pad tile-aligned

    def pad2(a, rows, cols, dtype):
        return jnp.pad(a, ((0, rows - a.shape[0]), (0, cols - a.shape[1]))).astype(dtype)

    xp   = pad2(x,   n_pad, f0p,  jnp.bfloat16)
    adjp = pad2(adj, n_pad, n_pad, jnp.bfloat16)   # TODO(synk): int8/fp8 adj storage (see header)
    w1p  = pad2(w1,  f0p, f1p, jnp.bfloat16)
    w2p  = pad2(w2,  f1p, f2p, jnp.bfloat16)
    w3p  = pad2(w3,  f2p, f3p, jnp.bfloat16)
    b1p  = pad2(b1,  1, f1p, jnp.float32)
    b2p  = pad2(b2,  1, f2p, jnp.float32)
    b3p  = pad2(b3,  1, f3p, jnp.float32)

    # S1 = x @ W1                                   (standalone transform)
    s1 = _transform(xp, w1p, tm, vmem_limit)
    # S2 = relu(adj @ S1 + b1) @ W2                 (fused aggregate + next transform)
    s2 = _fused_layer(adjp, s1, b1p, w2p, tm, vmem_limit)
    # S3 = relu(adj @ S2 + b2) @ W3
    s3 = _fused_layer(adjp, s2, b2p, w3p, tm, vmem_limit)
    # out = log_softmax(adj @ S3 + b3)              (padded class lanes masked)
    out = _final_layer(adjp, s3, b3p, nclass, tm, vmem_limit)
    return out[:n, :nclass]


# ---------------- reference / init / test ----------------

def init_params(key, nfeat, nhid, nclass):
    """Deterministic init mimicking GraphConvolution's uniform(-stdv, stdv)."""
    dims = [(nfeat, nhid * 2), (nhid * 2, nhid), (nhid, nclass)]
    params = []
    for (fin, fout) in dims:
        key, kw, kb = jax.random.split(key, 3)
        stdv = 1.0 / jnp.sqrt(jnp.float32(fout))
        w = jax.random.uniform(kw, (fin, fout), jnp.float32, -stdv, stdv)
        b = jax.random.uniform(kb, (1, fout), jnp.float32, -stdv, stdv)
        params += [w, b]
    return tuple(params)


def gnn_three_hop_ref(x, adj, params):
    w1, b1, w2, b2, w3, b3 = params
    h = jax.nn.relu(adj @ (x @ w1) + b1)
    h = jax.nn.relu(adj @ (h @ w2) + b2)
    h = adj @ (h @ w3) + b3
    return jax.nn.log_softmax(h, axis=1)


if __name__ == "__main__":
    key = jax.random.PRNGKey(0)
    N, nfeat, nhid, nclass = 64, 32, 16, 8

    kx, kadj, kp = jax.random.split(key, 3)
    x = jax.random.normal(kx, (N, nfeat), jnp.float32)

    # symmetric normalized adjacency with self loops
    a = (jax.random.uniform(kadj, (N, N)) > 0.8).astype(jnp.float32)
    a = jnp.maximum(a, a.T) + jnp.eye(N, dtype=jnp.float32)
    deg_inv_sqrt = 1.0 / jnp.sqrt(jnp.sum(a, axis=1, keepdims=True))
    adj = a * deg_inv_sqrt * deg_inv_sqrt.T

    params = init_params(kp, nfeat, nhid, nclass)

    fwd = jax.jit(gnn_three_hop)
    out = jax.block_until_ready(fwd(x, adj, params))

    ref = gnn_three_hop_ref(x, adj, params)
    assert out.shape == (N, nclass)
    err = float(jnp.max(jnp.abs(out - ref)))
    # bf16 matmul inputs (f32 accumulation) -> looser tolerance than pure f32
    assert jnp.allclose(out, ref, atol=5e-2, rtol=5e-2), f"max abs err {err}"

    print("KERNEL_OK")
</pallas_src>

<mosaic_0001>
module attributes {stable_mosaic.version = 11 : i64} {
  func.func @_transform_kernel(%arg0: i32, %arg1: memref<128x128xbf16, #tpu.memory_space<vmem>>, %arg2: memref<128x128xbf16, #tpu.memory_space<vmem>>, %arg3: memref<128x128xbf16, #tpu.memory_space<vmem>>) attributes {dimension_semantics = [#tpu.dimension_semantics<parallel>], iteration_bounds = array<i64: 1>, scalar_prefetch = 0 : i64, scratch_operands = 0 : i64, tpu.core_type = #tpu.core_type<tc>, window_params = [{transform_indices = @transform_0, window_bounds = array<i64: 128, 128>}, {pipeline_mode = #tpu.pipeline_mode<synchronous>, transform_indices = @transform_1, window_bounds = array<i64: 128, 128>}, {transform_indices = @transform_2, window_bounds = array<i64: 128, 128>}]} {
    %c0 = arith.constant 0 : index
    %c0_0 = arith.constant 0 : index
    %0 = vector.load %arg1[%c0, %c0_0] : memref<128x128xbf16, #tpu.memory_space<vmem>>, vector<128x128xbf16>
    %c0_1 = arith.constant 0 : index
    %c0_2 = arith.constant 0 : index
    %1 = vector.load %arg2[%c0_1, %c0_2] : memref<128x128xbf16, #tpu.memory_space<vmem>>, vector<128x128xbf16>
    %cst = arith.constant dense<0.000000e+00> : vector<128x128xf32>
    %2 = tpu.matmul %0, %1, %cst {dimension_numbers = #tpu.dot_dimension_numbers<[1], [0], [0], [1], [0, 0, 1, 1], [], []>} : vector<128x128xbf16>, vector<128x128xbf16>, vector<128x128xf32> -> vector<128x128xf32>
    %3 = arith.truncf %2 : vector<128x128xf32> to vector<128x128xbf16>
    %c0_3 = arith.constant 0 : index
    %c0_4 = arith.constant 0 : index
    %4 = vector.load %arg3[%c0_3, %c0_4] : memref<128x128xbf16, #tpu.memory_space<vmem>>, vector<128x128xbf16>
    tpu.vector_store %arg3[%c0_3, %c0_4], %3 {strides = array<i32>} : memref<128x128xbf16, #tpu.memory_space<vmem>>, vector<128x128xbf16>,
    return
  }
  func.func @transform_0(%arg0: i32) -> (i32, i32) {
    %c0_i32 = arith.constant 0 : i32
    %c0_i32_0 = arith.constant 0 : i32
    return %arg0, %c0_i32 : i32, i32
  }
  func.func @transform_1(%arg0: i32) -> (i32, i32) {
    %c0_i32 = arith.constant 0 : i32
    %c0_i32_0 = arith.constant 0 : i32
    %c0_i32_1 = arith.constant 0 : i32
    return %c0_i32, %c0_i32_0 : i32, i32
  }
  func.func @transform_2(%arg0: i32) -> (i32, i32) {
    %c0_i32 = arith.constant 0 : i32
    %c0_i32_0 = arith.constant 0 : i32
    return %arg0, %c0_i32 : i32, i32
  }
}

module attributes {stable_mosaic.version = 11 : i64} {
  func.func @_fused_agg_transform_kernel(%arg0: i32, %arg1: memref<128x128xbf16, #tpu.memory_space<vmem>>, %arg2: memref<128x128xbf16, #tpu.memory_space<vmem>>, %arg3: memref<1x128xf32, #tpu.memory_space<vmem>>, %arg4: memref<128x128xbf16, #tpu.memory_space<vmem>>, %arg5: memref<128x128xbf16, #tpu.memory_space<vmem>>) attributes {dimension_semantics = [#tpu.dimension_semantics<parallel>], iteration_bounds = array<i64: 1>, scalar_prefetch = 0 : i64, scratch_operands = 0 : i64, tpu.core_type = #tpu.core_type<tc>, window_params = [{transform_indices = @transform_0, window_bounds = array<i64: 128, 128>}, {pipeline_mode = #tpu.pipeline_mode<synchronous>, transform_indices = @transform_1, window_bounds = array<i64: 128, 128>}, {pipeline_mode = #tpu.pipeline_mode<synchronous>, transform_indices = @transform_2, window_bounds = array<i64: 1, 128>}, {pipeline_mode = #tpu.pipeline_mode<synchronous>, transform_indices = @transform_3, window_bounds = array<i64: 128, 128>}, {transform_indices = @transform_4, window_bounds = array<i64: 128, 128>}]} {
    %c0 = arith.constant 0 : index
    %c0_0 = arith.constant 0 : index
    %0 = vector.load %arg1[%c0, %c0_0] : memref<128x128xbf16, #tpu.memory_space<vmem>>, vector<128x128xbf16>
    %c0_1 = arith.constant 0 : index
    %c0_2 = arith.constant 0 : index
    %1 = vector.load %arg2[%c0_1, %c0_2] : memref<128x128xbf16, #tpu.memory_space<vmem>>, vector<128x128xbf16>
    %cst = arith.constant dense<0.000000e+00> : vector<128x128xf32>
    %2 = tpu.matmul %0, %1, %cst {dimension_numbers = #tpu.dot_dimension_numbers<[1], [0], [0], [1], [0, 0, 1, 1], [], []>} : vector<128x128xbf16>, vector<128x128xbf16>, vector<128x128xf32> -> vector<128x128xf32>
    %c0_3 = arith.constant 0 : index
    %c0_4 = arith.constant 0 : index
    %3 = vector.load %arg3[%c0_3, %c0_4] : memref<1x128xf32, #tpu.memory_space<vmem>>, vector<1x128xf32>
    %4 = vector.broadcast %3 : vector<1x128xf32> to vector<128x128xf32>
    %5 = arith.addf %2, %4 : vector<128x128xf32>
    %cst_5 = arith.constant 0.000000e+00 : f32
    %6 = vector.broadcast %cst_5 : f32 to vector<128x128xf32>
    %7 = arith.maximumf %5, %6 : vector<128x128xf32>
    %8 = arith.truncf %7 : vector<128x128xf32> to vector<128x128xbf16>
    %c0_6 = arith.constant 0 : index
    %c0_7 = arith.constant 0 : index
    %9 = vector.load %arg4[%c0_6, %c0_7] : memref<128x128xbf16, #tpu.memory_space<vmem>>, vector<128x128xbf16>
    %cst_8 = arith.constant dense<0.000000e+00> : vector<128x128xf32>
    %10 = tpu.matmul %8, %9, %cst_8 {dimension_numbers = #tpu.dot_dimension_numbers<[1], [0], [0], [1], [0, 0, 1, 1], [], []>} : vector<128x128xbf16>, vector<128x128xbf16>, vector<128x128xf32> -> vector<128x128xf32>
    %11 = arith.truncf %10 : vector<128x128xf32> to vector<128x128xbf16>
    %c0_9 = arith.constant 0 : index
    %c0_10 = arith.constant 0 : index
    %12 = vector.load %arg5[%c0_9, %c0_10] : memref<128x128xbf16, #tpu.memory_space<vmem>>, vector<128x128xbf16>
    tpu.vector_store %arg5[%c0_9, %c0_10], %11 {strides = array<i32>} : memref<128x128xbf16, #tpu.memory_space<vmem>>, vector<128x128xbf16>,
    return
  }
  func.func @transform_0(%arg0: i32) -> (i32, i32) {
    %c0_i32 = arith.constant 0 : i32
    %c0_i32_0 = arith.constant 0 : i32
    return %arg0, %c0_i32 : i32, i32
  }
  func.func @transform_1(%arg0: i32) -> (i32, i32) {
    %c0_i32 = arith.constant 0 : i32
    %c0_i32_0 = arith.constant 0 : i32
    %c0_i32_1 = arith.constant 0 : i32
    return %c0_i32, %c0_i32_0 : i32, i32
  }
  func.func @transform_2(%arg0: i32) -> (i32, i32) {
    %c0_i32 = arith.constant 0 : i32
    %c0_i32_0 = arith.constant 0 : i32
    %c0_i32_1 = arith.constant 0 : i32
    return %c0_i32, %c0_i32_0 : i32, i32
  }
  func.func @transform_3(%arg0: i32) -> (i32, i32) {
    %c0_i32 = arith.constant 0 : i32
    %c0_i32_0 = arith.constant 0 : i32
    %c0_i32_1 = arith.constant 0 : i32
    return %c0_i32, %c0_i32_0 : i32, i32
  }
  func.func @transform_4(%arg0: i32) -> (i32, i32) {
    %c0_i32 = arith.constant 0 : i32
    %c0_i32_0 = arith.constant 0 : i32
    return %arg0, %c0_i32 : i32, i32
  }
}

module attributes {stable_mosaic.version = 11 : i64} {
  func.func @_final_agg_logsoftmax_kernel(%arg0: i32, %arg1: memref<128x128xbf16, #tpu.memory_space<vmem>>, %arg2: memref<128x128xbf16, #tpu.memory_space<vmem>>, %arg3: memref<1x128xf32, #tpu.memory_space<vmem>>, %arg4: memref<128x128xf32, #tpu.memory_space<vmem>>) attributes {dimension_semantics = [#tpu.dimension_semantics<parallel>], iteration_bounds = array<i64: 1>, scalar_prefetch = 0 : i64, scratch_operands = 0 : i64, tpu.core_type = #tpu.core_type<tc>, window_params = [{transform_indices = @transform_0, window_bounds = array<i64: 128, 128>}, {pipeline_mode = #tpu.pipeline_mode<synchronous>, transform_indices = @transform_1, window_bounds = array<i64: 128, 128>}, {pipeline_mode = #tpu.pipeline_mode<synchronous>, transform_indices = @transform_2, window_bounds = array<i64: 1, 128>}, {transform_indices = @transform_3, window_bounds = array<i64: 128, 128>}]} {
    %c0 = arith.constant 0 : index
    %c0_0 = arith.constant 0 : index
    %0 = vector.load %arg1[%c0, %c0_0] : memref<128x128xbf16, #tpu.memory_space<vmem>>, vector<128x128xbf16>
    %c0_1 = arith.constant 0 : index
    %c0_2 = arith.constant 0 : index
    %1 = vector.load %arg2[%c0_1, %c0_2] : memref<128x128xbf16, #tpu.memory_space<vmem>>, vector<128x128xbf16>
    %cst = arith.constant dense<0.000000e+00> : vector<128x128xf32>
    %2 = tpu.matmul %0, %1, %cst {dimension_numbers = #tpu.dot_dimension_numbers<[1], [0], [0], [1], [0, 0, 1, 1], [], []>} : vector<128x128xbf16>, vector<128x128xbf16>, vector<128x128xf32> -> vector<128x128xf32>
    %c0_3 = arith.constant 0 : index
    %c0_4 = arith.constant 0 : index
    %3 = vector.load %arg3[%c0_3, %c0_4] : memref<1x128xf32, #tpu.memory_space<vmem>>, vector<1x128xf32>
    %4 = vector.broadcast %3 : vector<1x128xf32> to vector<128x128xf32>
    %5 = arith.addf %2, %4 : vector<128x128xf32>
    %6 = tpu.iota {dimensions = array<i32: 1>} : vector<128x128xi32>
    %c8_i32 = arith.constant 8 : i32
    %7 = vector.broadcast %c8_i32 : i32 to vector<128x128xi32>
    %8 = arith.cmpi slt, %6, %7 : vector<128x128xi32>
    %cst_5 = arith.constant -1.000000e+30 : f32
    %9 = vector.broadcast %cst_5 : f32 to vector<128x128xf32>
    %10 = arith.select %8, %5, %9 : vector<128x128xi1>, vector<128x128xf32>
    %cst_6 = arith.constant dense<0xFF800000> : vector<128xf32>
    %11 = vector.multi_reduction <maximumf>, %10, %cst_6 [1] : vector<128x128xf32> to vector<128xf32>
    %12 = vector.shape_cast %11 : vector<128xf32> to vector<128x1xf32>
    %13 = vector.broadcast %12 : vector<128x1xf32> to vector<128x128xf32>
    %14 = arith.subf %10, %13 : vector<128x128xf32>
    %15 = math.exp %14 : vector<128x128xf32>
    %cst_7 = arith.constant dense<0.000000e+00> : vector<128xf32>
    %16 = vector.multi_reduction <add>, %15, %cst_7 [1] : vector<128x128xf32> to vector<128xf32>
    %17 = vector.shape_cast %16 : vector<128xf32> to vector<128x1xf32>
    %18 = math.log %17 : vector<128x1xf32>
    %19 = vector.broadcast %18 : vector<128x1xf32> to vector<128x128xf32>
    %20 = arith.subf %14, %19 : vector<128x128xf32>
    %c0_8 = arith.constant 0 : index
    %c0_9 = arith.constant 0 : index
    %21 = vector.load %arg4[%c0_8, %c0_9] : memref<128x128xf32, #tpu.memory_space<vmem>>, vector<128x128xf32>
    tpu.vector_store %arg4[%c0_8, %c0_9], %20 {strides = array<i32>} : memref<128x128xf32, #tpu.memory_space<vmem>>, vector<128x128xf32>,
    return
  }
  func.func @transform_0(%arg0: i32) -> (i32, i32) {
    %c0_i32 = arith.constant 0 : i32
    %c0_i32_0 = arith.constant 0 : i32
    return %arg0, %c0_i32 : i32, i32
  }
  func.func @transform_1(%arg0: i32) -> (i32, i32) {
    %c0_i32 = arith.constant 0 : i32
    %c0_i32_0 = arith.constant 0 : i32
    %c0_i32_1 = arith.constant 0 : i32
    return %c0_i32, %c0_i32_0 : i32, i32
  }
  func.func @transform_2(%arg0: i32) -> (i32, i32) {
    %c0_i32 = arith.constant 0 : i32
    %c0_i32_0 = arith.constant 0 : i32
    %c0_i32_1 = arith.constant 0 : i32
    return %c0_i32, %c0_i32_0 : i32, i32
  }
  func.func @transform_3(%arg0: i32) -> (i32, i32) {
    %c0_i32 = arith.constant 0 : i32
    %c0_i32_0 = arith.constant 0 : i32
    return %arg0, %c0_i32 : i32, i32
  }
}

</mosaic_0001>

<bundles_post_ra>
// kernel: gnn_three_hop.4
= control target key start
LH: loop header
LB: loop body
LE: loop exit
PB: predicated region body
PF: predicated region fallthrough
CT: control target
= control target key end

     0   :  { %s462_s1 = inlined_call_operand.vmem [shape: bf16[128,128], index: 1, kind: input, shape index: {}]   ;;  %s463_s0 = inlined_call_operand.vmem [shape: bf16[128,128], index: 0, kind: input, shape index: {}]   ;;  %s464_s2 = inlined_call_operand.vmem [shape: bf16[128,128], index: 2, kind: output, shape index: {}]  }
   0x1   :  { %v303_v0 = vld [vmem:[%s462_s1 + $0x38] sm:$0xff]  ;;  %v302_v1 = vld [vmem:[%s462_s1 + $0x30] sm:$0xff]  ;;  %v301_v2 = vld [vmem:[%s462_s1 + $0x28] sm:$0xff] }
   0x2   :  { %139 = vmatpush.bf16.msra.mxu0 %v303_v0  ;;  %351 = vmatpush.bf16.msra.mxu1 %v303_v0  ;;  %v300_v3 = vld [vmem:[%s462_s1 + $0x20] sm:$0xff]  ;;  %v299_v4 = vld [vmem:[%s462_s1 + $0x18] sm:$0xff]  ;;  %v298_v5 = vld [vmem:[%s462_s1 + $0x10] sm:$0xff] }
   0x3   :  { %352 = vmatpush.bf16.msra.mxu2 %v303_v0  ;;  %353 = vmatpush.bf16.msra.mxu3 %v303_v0  ;;  %v297_v6 = vld [vmem:[%s462_s1 + $0x8] sm:$0xff]  ;;  %v296_v7 = vld [vmem:[%s462_s1] sm:$0xff]  ;;  %v290_v9 = vld [vmem:[%s463_s0 + $0x10] sm:$0xff] }
   0x4   :  { %v288_v8 = vld [vmem:[%s463_s0] sm:$0xff]  ;;  %v294_v11 = vld [vmem:[%s463_s0 + $0x30] sm:$0xff]  ;;  %v289_v12 = vld [vmem:[%s463_s0 + $0x8] sm:$0xff] }
   0x5   :  { %v292_v10 = vld [vmem:[%s463_s0 + $0x20] sm:$0xff]  ;;  %v291_v13 = vld [vmem:[%s463_s0 + $0x18] sm:$0xff]  ;;  %v293_v14 = vld [vmem:[%s463_s0 + $0x28] sm:$0xff] }
   0x6   :  { %140 = vmatpush.bf16.msra.mxu0 %v302_v1  ;;  %354 = vmatpush.bf16.msra.mxu1 %v302_v1  ;;  %v295_v15 = vld [vmem:[%s463_s0 + $0x38] sm:$0xff] }
   0x7   :  { %355 = vmatpush.bf16.msra.mxu2 %v302_v1  ;;  %356 = vmatpush.bf16.msra.mxu3 %v302_v1 }
   0xa   :  { %141 = vmatpush.bf16.msra.mxu0 %v301_v2  ;;  %357 = vmatpush.bf16.msra.mxu1 %v301_v2 }
   0xb   :  { %358 = vmatpush.bf16.msra.mxu2 %v301_v2  ;;  %359 = vmatpush.bf16.msra.mxu3 %v301_v2 }
   0xe   :  { %142 = vmatpush.bf16.msra.mxu0 %v300_v3  ;;  %360 = vmatpush.bf16.msra.mxu1 %v300_v3 }
   0xf   :  { %361 = vmatpush.bf16.msra.mxu2 %v300_v3  ;;  %362 = vmatpush.bf16.msra.mxu3 %v300_v3 }
  0x12   :  { %143 = vmatpush.bf16.msra.mxu0 %v299_v4  ;;  %363 = vmatpush.bf16.msra.mxu1 %v299_v4 }
  0x13   :  { %364 = vmatpush.bf16.msra.mxu2 %v299_v4  ;;  %365 = vmatpush.bf16.msra.mxu3 %v299_v4 }
  0x16   :  { %144 = vmatpush.bf16.msra.mxu0 %v298_v5  ;;  %366 = vmatpush.bf16.msra.mxu1 %v298_v5 }
  0x17   :  { %367 = vmatpush.bf16.msra.mxu2 %v298_v5  ;;  %368 = vmatpush.bf16.msra.mxu3 %v298_v5 }
  0x1a   :  { %145 = vmatpush.bf16.msra.mxu0 %v297_v6  ;;  %369 = vmatpush.bf16.msra.mxu1 %v297_v6 }
  0x1b   :  { %370 = vmatpush.bf16.msra.mxu2 %v297_v6  ;;  %371 = vmatpush.bf16.msra.mxu3 %v297_v6 }
  0x1e   :  { %146 = vmatpush.bf16.msra.mxu0 %v296_v7  ;;  %372 = vmatpush.bf16.msra.mxu1 %v296_v7 }
  0x1f   :  { %373 = vmatpush.bf16.msra.mxu2 %v296_v7  ;;  %374 = vmatpush.bf16.msra.mxu3 %v296_v7 }
  0x21   :  { %147 = vmatmul.bf16.vlgmr.msra.gmra.mxu0 %v288_v8  ;;  %157 = vmatmul.bf16.vlgmr.msra.gmra.mxu1 %v290_v9 }
  0x22   :  { %167 = vmatmul.bf16.vlgmr.msra.gmra.mxu2 %v292_v10  ;;  %177 = vmatmul.bf16.vlgmr.msra.gmra.mxu3 %v294_v11 }
  0x31   :  { %152 = vmatmul.bf16.gmra.mxu0 %v289_v12  ;;  %162 = vmatmul.bf16.gmra.mxu1 %v291_v13 }
  0x32   :  { %172 = vmatmul.bf16.gmra.mxu2 %v293_v14  ;;  %182 = vmatmul.bf16.gmra.mxu3 %v295_v15 }
  0x9e   :  { %v148_v16 = vpop.f32.mrf.mxu0  ;;  %v158_v17 = vpop.f32.mrf.mxu1 }
  0xa5   :  { %v168_v18 = vpop.f32.mrf.mxu2  ;;  %v178_v19 = vpop.f32.mrf.mxu3 }
  0xa6   :  { %v150_v20 = vpop.f32.mrf.mxu0  ;;  %v160_v21 = vpop.f32.mrf.mxu1 }
  0xa7   :  { %v307_v22 = vpack.c.bf16 %v150_v20, %v148_v16  ;;  %v317_v23 = vpack.c.bf16 %v160_v21, %v158_v17 }
  0xa9   :  { %308 = vst [vmem:[%s464_s2] sm:$0xff] %v307_v22  }
  0xaa   :  { %345 = vst [vmem:[%s464_s2 + $0x10] sm:$0xff] %v317_v23  }
  0xad   :  { %v170_v24 = vpop.f32.mrf.mxu2  ;;  %v180_v25 = vpop.f32.mrf.mxu3 }
  0xae   :  { %v327_v26 = vpack.c.bf16 %v170_v24, %v168_v18  ;;  %v337_v27 = vpack.c.bf16 %v180_v25, %v178_v19  ;;  %v153_v28 = vpop.f32.mrf.mxu0  ;;  %v163_v29 = vpop.f32.mrf.mxu1 }
  0xb0   :  { %347 = vst [vmem:[%s464_s2 + $0x20] sm:$0xff] %v327_v26  }
  0xb1   :  { %349 = vst [vmem:[%s464_s2 + $0x30] sm:$0xff] %v337_v27  }
  0xb5   :  { %v173_v30 = vpop.f32.mrf.mxu2  ;;  %v183_v31 = vpop.f32.mrf.mxu3 }
  0xb6   :  { %v155_v32 = vpop.f32.mrf.mxu0  ;;  %v165_v33 = vpop.f32.mrf.mxu1 }
  0xb7   :  { %v312_v34 = vpack.c.bf16 %v155_v32, %v153_v28  ;;  %v322_v35 = vpack.c.bf16 %v165_v33, %v163_v29 }
  0xb9   :  { %344 = vst [vmem:[%s464_s2 + $0x8] sm:$0xff] %v312_v34  }
  0xba   :  { %346 = vst [vmem:[%s464_s2 + $0x18] sm:$0xff] %v322_v35  }
  0xbd   :  { %v175_v36 = vpop.f32.mrf.mxu2  ;;  %v185_v37 = vpop.f32.mrf.mxu3 }
  0xbe   :  { %v332_v38 = vpack.c.bf16 %v175_v36, %v173_v30  ;;  %v342_v39 = vpack.c.bf16 %v185_v37, %v183_v31 }
  0xc0   :  { %348 = vst [vmem:[%s464_s2 + $0x28] sm:$0xff] %v332_v38  }
  0xc1   :  { %350 = vst [vmem:[%s464_s2 + $0x38] sm:$0xff] %v342_v39  }

// kernel: gnn_three_hop.5
= control target key start
LH: loop header
LB: loop body
LE: loop exit
PB: predicated region body
PF: predicated region fallthrough
CT: control target
= control target key end

     0   :  { %s679_s1 = inlined_call_operand.vmem [shape: bf16[128,128], index: 1, kind: input, shape index: {}]   ;;  %s680_s2 = inlined_call_operand.vmem [shape: f32[1,128], index: 2, kind: input, shape index: {}]   ;;  %s681_s0 = inlined_call_operand.vmem [shape: bf16[128,128], index: 0, kind: input, shape index: {}]   ;;  %s682_s3 = inlined_call_operand.vmem [shape: bf16[128,128], index: 3, kind: input, shape index: {}]   ;;  %s683_s4 = inlined_call_operand.vmem [shape: bf16[128,128], index: 4, kind: output, shape index: {}]  }
   0x1   :  { %v482_v0 = vld [vmem:[%s679_s1 + $0x38] sm:$0xff]  ;;  %v481_v1 = vld [vmem:[%s679_s1 + $0x30] sm:$0xff]  ;;  %v480_v2 = vld [vmem:[%s679_s1 + $0x28] sm:$0xff] }
   0x2   :  { %149 = vmatpush.bf16.msra.mxu0 %v482_v0  ;;  %538 = vmatpush.bf16.msra.mxu2 %v482_v0  ;;  %v479_v3 = vld [vmem:[%s679_s1 + $0x20] sm:$0xff]  ;;  %v478_v4 = vld [vmem:[%s679_s1 + $0x18] sm:$0xff]  ;;  %v477_v5 = vld [vmem:[%s679_s1 + $0x10] sm:$0xff] }
   0x3   :  { %v476_v6 = vld [vmem:[%s679_s1 + $0x8] sm:$0xff]  ;;  %v475_v7 = vld [vmem:[%s679_s1] sm:$0xff]  ;;  %v490_v12 = vld [vmem:[%s682_s3 + $0x38] sm:$0xff] }
   0x4   :  { %v467_v8 = vld [vmem:[%s681_s0] sm:$0xff]  ;;  %v468_v10 = vld [vmem:[%s681_s0 + $0x8] sm:$0xff]  ;;  %286 = vmatpush.bf16.msra.mxu1 %v490_v12  ;;  %v489_v13 = vld [vmem:[%s682_s3 + $0x30] sm:$0xff]  ;;  %546 = vmatpush.bf16.msra.mxu3 %v490_v12 }
   0x5   :  { %v471_v9 = vld [vmem:[%s681_s0 + $0x20] sm:$0xff]  ;;  %v472_v11 = vld [vmem:[%s681_s0 + $0x28] sm:$0xff]  ;;  %v469_v16 = vld [vmem:[%s681_s0 + $0x10] sm:$0xff] }
   0x6   :  { %150 = vmatpush.bf16.msra.mxu0 %v481_v1  ;;  %539 = vmatpush.bf16.msra.mxu2 %v481_v1  ;;  %v488_v14 = vld [vmem:[%s682_s3 + $0x28] sm:$0xff]  ;;  %v487_v15 = vld [vmem:[%s682_s3 + $0x20] sm:$0xff]  ;;  %v473_v17 = vld [vmem:[%s681_s0 + $0x30] sm:$0xff] }
   0x7   :  { %v470_v18 = vld [vmem:[%s681_s0 + $0x18] sm:$0xff]  ;;  %v485_v21 = vld [vmem:[%s682_s3 + $0x10] sm:$0xff]  ;;  %v484_v22 = vld [vmem:[%s682_s3 + $0x8] sm:$0xff] }
   0x8   :  { %287 = vmatpush.bf16.msra.mxu1 %v489_v13  ;;  %547 = vmatpush.bf16.msra.mxu3 %v489_v13  ;;  %v474_v19 = vld [vmem:[%s681_s0 + $0x38] sm:$0xff]  ;;  %v483_v23 = vld [vmem:[%s682_s3] sm:$0xff] }
   0x9   :  { %v486_v20 = vld [vmem:[%s682_s3 + $0x18] sm:$0xff]  ;;  %v554_v25 = vld [vmem:[%s680_s2] ss:$0 sm:$0xff] }
   0xa   :  { %151 = vmatpush.bf16.msra.mxu0 %v480_v2  ;;  %540 = vmatpush.bf16.msra.mxu2 %v480_v2 }
   0xc   :  { %288 = vmatpush.bf16.msra.mxu1 %v488_v14  ;;  %548 = vmatpush.bf16.msra.mxu3 %v488_v14 }
   0xe   :  { %152 = vmatpush.bf16.msra.mxu0 %v479_v3  ;;  %541 = vmatpush.bf16.msra.mxu2 %v479_v3 }
  0x10   :  { %289 = vmatpush.bf16.msra.mxu1 %v487_v15  ;;  %549 = vmatpush.bf16.msra.mxu3 %v487_v15 }
  0x12   :  { %153 = vmatpush.bf16.msra.mxu0 %v478_v4  ;;  %542 = vmatpush.bf16.msra.mxu2 %v478_v4 }
  0x14   :  { %290 = vmatpush.bf16.msra.mxu1 %v486_v20  ;;  %550 = vmatpush.bf16.msra.mxu3 %v486_v20 }
  0x16   :  { %154 = vmatpush.bf16.msra.mxu0 %v477_v5  ;;  %543 = vmatpush.bf16.msra.mxu2 %v477_v5 }
  0x18   :  { %291 = vmatpush.bf16.msra.mxu1 %v485_v21  ;;  %551 = vmatpush.bf16.msra.mxu3 %v485_v21 }
  0x1a   :  { %155 = vmatpush.bf16.msra.mxu0 %v476_v6  ;;  %544 = vmatpush.bf16.msra.mxu2 %v476_v6 }
  0x1c   :  { %292 = vmatpush.bf16.msra.mxu1 %v484_v22  ;;  %552 = vmatpush.bf16.msra.mxu3 %v484_v22 }
  0x1e   :  { %156 = vmatpush.bf16.msra.mxu0 %v475_v7  ;;  %545 = vmatpush.bf16.msra.mxu2 %v475_v7 }
  0x20   :  { %293 = vmatpush.bf16.msra.mxu1 %v483_v23  ;;  %553 = vmatpush.bf16.msra.mxu3 %v483_v23 }
  0x21   :  { %157 = vmatmul.bf16.vlgmr.msra.gmra.mxu0 %v467_v8  ;;  %177 = vmatmul.bf16.vlgmr.msra.gmra.mxu2 %v471_v9 }
  0x31   :  { %162 = vmatmul.bf16.gmra.mxu0 %v468_v10  ;;  %182 = vmatmul.bf16.gmra.mxu2 %v472_v11 }
  0x41   :  { %167 = vmatmul.bf16.gmra.mxu0 %v469_v16  ;;  %187 = vmatmul.bf16.gmra.mxu2 %v473_v17 }
  0x51   :  { %172 = vmatmul.bf16.gmra.mxu0 %v470_v18  ;;  %192 = vmatmul.bf16.gmra.mxu2 %v474_v19 }
  0x9e   :  { %v158_v24 = vpop.f32.mrf.mxu0 }
  0x9f   :  { %v159_v26 = vadd.f32 %v554_v25, %v158_v24 }
  0xa1   :  { %v198_v29 = vmax.f32 %v159_v26, 0.0 }
  0xa4   :  { %v178_v27 = vpop.f32.mrf.mxu2 }
  0xa5   :  { %v179_v32 = vadd.f32 %v554_v25, %v178_v27 }
  0xa6   :  { %v160_v28 = vpop.f32.mrf.mxu0 }
  0xa7   :  { %v161_v30 = vadd.f32 %v554_v25, %v160_v28  ;;  %v206_v37 = vmax.f32 %v179_v32, 0.0 }
  0xa9   :  { %v199_v31 = vmax.f32 %v161_v30, 0.0 }
  0xab   :  { %v214_v33 = vpack.c.bf16 %v199_v31, %v198_v29 }
  0xac   :  { %v180_v34 = vpop.f32.mrf.mxu2 }
  0xad   :  { %v181_v35 = vadd.f32 %v554_v25, %v180_v34  ;;  %294 = vmatmul.bf16.vlgmr.msra.gmra.mxu1 %v214_v33 }
  0xae   :  { %v163_v36 = vpop.f32.mrf.mxu0 }
  0xaf   :  { %v207_v38 = vmax.f32 %v181_v35, 0.0  ;;  %v164_v40 = vadd.f32 %v554_v25, %v163_v36 }
  0xb1   :  { %v218_v39 = vpack.c.bf16 %v207_v38, %v206_v37  ;;  %v200_v43 = vmax.f32 %v164_v40, 0.0 }
  0xb3   :  { %314 = vmatmul.bf16.vlgmr.msra.gmra.mxu3 %v218_v39 }
  0xb4   :  { %v183_v41 = vpop.f32.mrf.mxu2 }
  0xb5   :  { %v184_v46 = vadd.f32 %v554_v25, %v183_v41 }
  0xb6   :  { %v165_v42 = vpop.f32.mrf.mxu0 }
  0xb7   :  { %v166_v44 = vadd.f32 %v554_v25, %v165_v42  ;;  %v208_v51 = vmax.f32 %v184_v46, 0.0 }
  0xb9   :  { %v201_v45 = vmax.f32 %v166_v44, 0.0 }
  0xbb   :  { %v215_v47 = vpack.c.bf16 %v201_v45, %v200_v43 }
  0xbc   :  { %v185_v48 = vpop.f32.mrf.mxu2 }
  0xbd   :  { %v186_v49 = vadd.f32 %v554_v25, %v185_v48  ;;  %299 = vmatmul.bf16.gmra.mxu1 %v215_v47 }
  0xbe   :  { %v168_v50 = vpop.f32.mrf.mxu0 }
  0xbf   :  { %v209_v52 = vmax.f32 %v186_v49, 0.0  ;;  %v169_v54 = vadd.f32 %v554_v25, %v168_v50 }
  0xc1   :  { %v219_v53 = vpack.c.bf16 %v209_v52, %v208_v51  ;;  %v202_v57 = vmax.f32 %v169_v54, 0.0 }
  0xc3   :  { %319 = vmatmul.bf16.gmra.mxu3 %v219_v53 }
  0xc4   :  { %v188_v55 = vpop.f32.mrf.mxu2 }
  0xc5   :  { %v189_v60 = vadd.f32 %v554_v25, %v188_v55 }
  0xc6   :  { %v170_v56 = vpop.f32.mrf.mxu0 }
  0xc7   :  { %v171_v58 = vadd.f32 %v554_v25, %v170_v56  ;;  %v210_v1 = vmax.f32 %v189_v60, 0.0 }
  0xc9   :  { %v203_v59 = vmax.f32 %v171_v58, 0.0 }
  0xcb   :  { %v216_v61 = vpack.c.bf16 %v203_v59, %v202_v57 }
  0xcc   :  { %v190_v62 = vpop.f32.mrf.mxu2 }
  0xcd   :  { %v191_v63 = vadd.f32 %v554_v25, %v190_v62  ;;  %304 = vmatmul.bf16.gmra.mxu1 %v216_v61 }
  0xce   :  { %v173_v0 = vpop.f32.mrf.mxu0 }
  0xcf   :  { %v211_v2 = vmax.f32 %v191_v63, 0.0  ;;  %v174_v4 = vadd.f32 %v554_v25, %v173_v0 }
  0xd1   :  { %v220_v3 = vpack.c.bf16 %v211_v2, %v210_v1  ;;  %v204_v7 = vmax.f32 %v174_v4, 0.0 }
  0xd3   :  { %324 = vmatmul.bf16.gmra.mxu3 %v220_v3 }
  0xd4   :  { %v193_v5 = vpop.f32.mrf.mxu2 }
  0xd5   :  { %v194_v10 = vadd.f32 %v554_v25, %v193_v5 }
  0xd6   :  { %v175_v6 = vpop.f32.mrf.mxu0 }
  0xd7   :  { %v176_v8 = vadd.f32 %v554_v25, %v175_v6  ;;  %v212_v14 = vmax.f32 %v194_v10, 0.0 }
  0xd9   :  { %v205_v9 = vmax.f32 %v176_v8, 0.0 }
  0xdb   :  { %v217_v11 = vpack.c.bf16 %v205_v9, %v204_v7 }
  0xdc   :  { %v195_v12 = vpop.f32.mrf.mxu2 }
  0xdd   :  { %v196_v13 = vadd.f32 %v554_v25, %v195_v12  ;;  %309 = vmatmul.bf16.gmra.mxu1 %v217_v11 }
  0xdf   :  { %v213_v15 = vmax.f32 %v196_v13, 0.0 }
  0xe1   :  { %v221_v16 = vpack.c.bf16 %v213_v15, %v212_v14 }
  0xe3   :  { %329 = vmatmul.bf16.gmra.mxu3 %v221_v16 }
 0x12a   :  { %v295_v17 = vpop.f32.mrf.mxu1 }
 0x132   :  { %v297_v18 = vpop.f32.mrf.mxu1 }
 0x133   :  { %v494_v19 = vpack.c.bf16 %v297_v18, %v295_v17 }
 0x135   :  { %495 = vst [vmem:[%s683_s4] sm:$0xff] %v494_v19  }
 0x136   :  { %v315_v20 = vpop.f32.mrf.mxu3 }
 0x13a   :  { %v300_v21 = vpop.f32.mrf.mxu1 }
 0x13e   :  { %v317_v22 = vpop.f32.mrf.mxu3 }
 0x13f   :  { %v514_v23 = vpack.c.bf16 %v317_v22, %v315_v20 }
 0x141   :  { %534 = vst [vmem:[%s683_s4 + $0x20] sm:$0xff] %v514_v23  }
 0x142   :  { %v302_v24 = vpop.f32.mrf.mxu1 }
 0x143   :  { %v499_v25 = vpack.c.bf16 %v302_v24, %v300_v21 }
 0x145   :  { %531 = vst [vmem:[%s683_s4 + $0x8] sm:$0xff] %v499_v25  }
 0x146   :  { %v320_v26 = vpop.f32.mrf.mxu3 }
 0x14a   :  { %v305_v27 = vpop.f32.mrf.mxu1 }
 0x14e   :  { %v322_v28 = vpop.f32.mrf.mxu3 }
 0x14f   :  { %v519_v29 = vpack.c.bf16 %v322_v28, %v320_v26 }
 0x151   :  { %535 = vst [vmem:[%s683_s4 + $0x28] sm:$0xff] %v519_v29  }
 0x152   :  { %v307_v30 = vpop.f32.mrf.mxu1 }
 0x153   :  { %v504_v31 = vpack.c.bf16 %v307_v30, %v305_v27 }
 0x155   :  { %532 = vst [vmem:[%s683_s4 + $0x10] sm:$0xff] %v504_v31  }
 0x156   :  { %v325_v32 = vpop.f32.mrf.mxu3 }
 0x15a   :  { %v310_v33 = vpop.f32.mrf.mxu1 }
 0x15e   :  { %v327_v34 = vpop.f32.mrf.mxu3 }
 0x15f   :  { %v524_v35 = vpack.c.bf16 %v327_v34, %v325_v32 }
 0x161   :  { %536 = vst [vmem:[%s683_s4 + $0x30] sm:$0xff] %v524_v35  }
 0x162   :  { %v312_v36 = vpop.f32.mrf.mxu1 }
 0x163   :  { %v509_v37 = vpack.c.bf16 %v312_v36, %v310_v33 }
 0x165   :  { %533 = vst [vmem:[%s683_s4 + $0x18] sm:$0xff] %v509_v37  }
 0x166   :  { %v330_v38 = vpop.f32.mrf.mxu3 }
 0x16e   :  { %v332_v39 = vpop.f32.mrf.mxu3 }
 0x16f   :  { %v529_v40 = vpack.c.bf16 %v332_v39, %v330_v38 }
 0x171   :  { %537 = vst [vmem:[%s683_s4 + $0x38] sm:$0xff] %v529_v40  }

// kernel: gnn_three_hop.7
= control target key start
LH: loop header
LB: loop body
LE: loop exit
PB: predicated region body
PF: predicated region fallthrough
CT: control target
= control target key end

     0   :  { %v195_v16 = vlaneseq  ;;  %s839_s1 = inlined_call_operand.vmem [shape: bf16[128,128], index: 1, kind: input, shape index: {}]   ;;  %s840_s2 = inlined_call_operand.vmem [shape: f32[1,128], index: 2, kind: input, shape index: {}]   ;;  %s841_s0 = inlined_call_operand.vmem [shape: bf16[128,128], index: 0, kind: input, shape index: {}]   ;;  %s842_s3 = inlined_call_operand.vmem [shape: f32[128,128], index: 3, kind: output, shape index: {}]  }
   0x1   :  { %v473_v0 = vld [vmem:[%s839_s1 + $0x38] sm:$0xff]  ;;  %v472_v1 = vld [vmem:[%s839_s1 + $0x30] sm:$0xff]  ;;  %v471_v2 = vld [vmem:[%s839_s1 + $0x28] sm:$0xff] }
   0x2   :  { %146 = vmatpush.bf16.msra.mxu0 %v473_v0  ;;  %474 = vmatpush.bf16.msra.mxu1 %v473_v0  ;;  %v470_v3 = vld [vmem:[%s839_s1 + $0x20] sm:$0xff]  ;;  %v469_v4 = vld [vmem:[%s839_s1 + $0x18] sm:$0xff]  ;;  %v468_v5 = vld [vmem:[%s839_s1 + $0x10] sm:$0xff]  ;;  %v631_v17 = vand.u32 127, %v195_v16 }
   0x3   :  { %475 = vmatpush.bf16.msra.mxu2 %v473_v0  ;;  %476 = vmatpush.bf16.msra.mxu3 %v473_v0  ;;  %v467_v6 = vld [vmem:[%s839_s1 + $0x8] sm:$0xff]  ;;  %v466_v7 = vld [vmem:[%s839_s1] sm:$0xff]  ;;  %v460_v9 = vld [vmem:[%s841_s0 + $0x10] sm:$0xff] }
   0x4   :  { %v458_v8 = vld [vmem:[%s841_s0] sm:$0xff]  ;;  %v464_v11 = vld [vmem:[%s841_s0 + $0x30] sm:$0xff]  ;;  %v459_v12 = vld [vmem:[%s841_s0 + $0x8] sm:$0xff]  ;;  %vm197_vm0 = vcmp.lt.s32.totalorder %v631_v17, 8 }
   0x5   :  { %v462_v10 = vld [vmem:[%s841_s0 + $0x20] sm:$0xff]  ;;  %v461_v13 = vld [vmem:[%s841_s0 + $0x18] sm:$0xff]  ;;  %v463_v14 = vld [vmem:[%s841_s0 + $0x28] sm:$0xff] }
   0x6   :  { %147 = vmatpush.bf16.msra.mxu0 %v472_v1  ;;  %477 = vmatpush.bf16.msra.mxu1 %v472_v1  ;;  %v465_v15 = vld [vmem:[%s841_s0 + $0x38] sm:$0xff]  ;;  %v636_v18 = vld [vmem:[%s840_s2] ss:$0 sm:$0xff] }
   0x7   :  { %478 = vmatpush.bf16.msra.mxu2 %v472_v1  ;;  %479 = vmatpush.bf16.msra.mxu3 %v472_v1 }
   0xa   :  { %148 = vmatpush.bf16.msra.mxu0 %v471_v2  ;;  %480 = vmatpush.bf16.msra.mxu1 %v471_v2 }
   0xb   :  { %481 = vmatpush.bf16.msra.mxu2 %v471_v2  ;;  %482 = vmatpush.bf16.msra.mxu3 %v471_v2 }
   0xe   :  { %149 = vmatpush.bf16.msra.mxu0 %v470_v3  ;;  %483 = vmatpush.bf16.msra.mxu1 %v470_v3 }
   0xf   :  { %484 = vmatpush.bf16.msra.mxu2 %v470_v3  ;;  %485 = vmatpush.bf16.msra.mxu3 %v470_v3 }
  0x12   :  { %150 = vmatpush.bf16.msra.mxu0 %v469_v4  ;;  %486 = vmatpush.bf16.msra.mxu1 %v469_v4 }
  0x13   :  { %487 = vmatpush.bf16.msra.mxu2 %v469_v4  ;;  %488 = vmatpush.bf16.msra.mxu3 %v469_v4 }
  0x16   :  { %151 = vmatpush.bf16.msra.mxu0 %v468_v5  ;;  %489 = vmatpush.bf16.msra.mxu1 %v468_v5 }
  0x17   :  { %490 = vmatpush.bf16.msra.mxu2 %v468_v5  ;;  %491 = vmatpush.bf16.msra.mxu3 %v468_v5 }
  0x1a   :  { %152 = vmatpush.bf16.msra.mxu0 %v467_v6  ;;  %492 = vmatpush.bf16.msra.mxu1 %v467_v6 }
  0x1b   :  { %493 = vmatpush.bf16.msra.mxu2 %v467_v6  ;;  %494 = vmatpush.bf16.msra.mxu3 %v467_v6 }
  0x1e   :  { %153 = vmatpush.bf16.msra.mxu0 %v466_v7  ;;  %495 = vmatpush.bf16.msra.mxu1 %v466_v7 }
  0x1f   :  { %496 = vmatpush.bf16.msra.mxu2 %v466_v7  ;;  %497 = vmatpush.bf16.msra.mxu3 %v466_v7 }
  0x21   :  { %154 = vmatmul.bf16.vlgmr.msra.gmra.mxu0 %v458_v8  ;;  %164 = vmatmul.bf16.vlgmr.msra.gmra.mxu1 %v460_v9 }
  0x22   :  { %174 = vmatmul.bf16.vlgmr.msra.gmra.mxu2 %v462_v10  ;;  %184 = vmatmul.bf16.vlgmr.msra.gmra.mxu3 %v464_v11 }
  0x31   :  { %159 = vmatmul.bf16.gmra.mxu0 %v459_v12  ;;  %169 = vmatmul.bf16.gmra.mxu1 %v461_v13 }
  0x32   :  { %179 = vmatmul.bf16.gmra.mxu2 %v463_v14  ;;  %189 = vmatmul.bf16.gmra.mxu3 %v465_v15 }
  0x9e   :  { %v155_v19 = vpop.f32.mrf.mxu0  ;;  %v165_v20 = vpop.f32.mrf.mxu1 }
  0x9f   :  { %v156_v21 = vadd.f32 %v636_v18, %v155_v19  ;;  %v166_v22 = vadd.f32 %v636_v18, %v165_v20 }
  0xa1   :  { %v202_v23 = vsel %vm197_vm0, %v166_v22, -1e+30  ;;  %v198_v24 = vsel %vm197_vm0, %v156_v21, -1e+30 }
  0xa2   :  { %222 = vmax.xlane.f32.xlu2 %v202_v23  ;;  %214 = vmax.xlane.f32.xlu0 %v198_v24 }
  0xa5   :  { %v175_v25 = vpop.f32.mrf.mxu2  ;;  %v185_v26 = vpop.f32.mrf.mxu3 }
  0xa6   :  { %v176_v27 = vadd.f32 %v636_v18, %v175_v25  ;;  %v186_v28 = vadd.f32 %v636_v18, %v185_v26  ;;  %v157_v29 = vpop.f32.mrf.mxu0  ;;  %v167_v32 = vpop.f32.mrf.mxu1 }
  0xa7   :  { %v168_v33 = vadd.f32 %v636_v18, %v167_v32  ;;  %v158_v35 = vadd.f32 %v636_v18, %v157_v29 }
  0xa8   :  { %v206_v30 = vsel %vm197_vm0, %v176_v27, -1e+30  ;;  %v210_v31 = vsel %vm197_vm0, %v186_v28, -1e+30 }
  0xa9   :  { %v203_v39 = vsel %vm197_vm0, %v168_v33, -1e+30  ;;  %v199_v41 = vsel %vm197_vm0, %v158_v35, -1e+30 }
  0xaa   :  { %230 = vmax.xlane.f32.xlu2 %v206_v30  ;;  %238 = vmax.xlane.f32.xlu0 %v210_v31 }
  0xad   :  { %v177_v34 = vpop.f32.mrf.mxu2  ;;  %v187_v37 = vpop.f32.mrf.mxu3 }
  0xae   :  { %v160_v36 = vpop.f32.mrf.mxu0  ;;  %v178_v43 = vadd.f32 %v636_v18, %v177_v34  ;;  %v170_v46 = vpop.f32.mrf.mxu1  ;;  %v188_v1 = vadd.f32 %v636_v18, %v187_v37 }
  0xaf   :  { %v161_v38 = vadd.f32 %v636_v18, %v160_v36  ;;  %v171_v50 = vadd.f32 %v636_v18, %v170_v46 }
  0xb0   :  { %v672_v49 = vsel %vm197_vm0, %v178_v43, -1e+30  ;;  %v714_v2 = vsel %vm197_vm0, %v188_v1, -1e+30 }
  0xb1   :  { %v658_v40 = vsel %vm197_vm0, %v161_v38, -1e+30  ;;  %v684_v55 = vsel %vm197_vm0, %v171_v50, -1e+30 }
  0xb2   :  { %224 = vmax.xlane.f32.xlu2 %v203_v39  ;;  %218 = vmax.xlane.f32.xlu1 %v658_v40 }
  0xb3   :  { %216 = vmax.xlane.f32.xlu0 %v199_v41 }
  0xb5   :  { %v180_v42 = vpop.f32.mrf.mxu2  ;;  %v190_v45 = vpop.f32.mrf.mxu3 }
  0xb6   :  { %v181_v44 = vadd.f32 %v636_v18, %v180_v42  ;;  %v162_v48 = vpop.f32.mrf.mxu0  ;;  %v172_v58 = vpop.f32.mrf.mxu1  ;;  %v191_v59 = vadd.f32 %v636_v18, %v190_v45 }
  0xb7   :  { %v163_v51 = vadd.f32 %v636_v18, %v162_v48  ;;  %v173_v61 = vadd.f32 %v636_v18, %v172_v58 }
  0xb8   :  { %v667_v47 = vsel %vm197_vm0, %v181_v44, -1e+30  ;;  %v698_v62 = vsel %vm197_vm0, %v191_v59, -1e+30 }
  0xb9   :  { %v689_v56 = vsel %vm197_vm0, %v163_v51, -1e+30  ;;  %v707_v0 = vsel %vm197_vm0, %v173_v61, -1e+30 }
  0xba   :  { %234 = vmax.xlane.f32.xlu1 %v667_v47 }
  0xbb   :  { %232 = vmax.xlane.f32.xlu0 %v672_v49 }
  0xbd   :  { %v182_v52 = vpop.f32.mrf.mxu2  ;;  %v192_v57 = vpop.f32.mrf.mxu3 }
  0xbe   :  { %v183_v53 = vadd.f32 %v636_v18, %v182_v52  ;;  %v193_v60 = vadd.f32 %v636_v18, %v192_v57 }
  0xc0   :  { %v680_v54 = vsel %vm197_vm0, %v183_v53, -1e+30  ;;  %v702_v63 = vsel %vm197_vm0, %v193_v60, -1e+30 }
  0xc1   :  { %236 = vmax.xlane.f32.xlu2 %v680_v54 }
  0xc2   :  { %220 = vmax.xlane.f32.xlu1 %v689_v56 }
  0xc3   :  { %226 = vmax.xlane.f32.xlu0 %v684_v55 }
  0xc9   :  { %242 = vmax.xlane.f32.xlu2 %v698_v62 }
  0xca   :  { %228 = vmax.xlane.f32.xlu1 %v707_v0 }
  0xcb   :  { %244 = vmax.xlane.f32.xlu0 %v702_v63 }
  0xd2   :  { %240 = vmax.xlane.f32.xlu1 %v714_v2 }
 0x115   :  { %v223_v3 = vpop.xlane.xlu2 %222  ;;  %v215_v4 = vpop.xlane.xlu0 %214 }
 0x116   :  { %v717_v5 = vsub.f32 %v202_v23, %v223_v3  ;;  %v719_v6 = vsub.f32 %v198_v24, %v215_v4 }
 0x118   :  { %v270_v7 = vmul.f32 1.442695, %v717_v5  ;;  %v262_v8 = vmul.f32 1.442695, %v719_v6 }
 0x11a   :  { %499 = vpow2.f32 %v270_v7 }
 0x11b   :  { %501 = vpow2.f32 %v262_v8 }
 0x11d   :  { %v231_v9 = vpop.xlane.xlu2 %230  ;;  %v239_v10 = vpop.xlane.xlu0 %238 }
 0x11e   :  { %v723_v11 = vsub.f32 %v206_v30, %v231_v9  ;;  %v725_v12 = vsub.f32 %v210_v31, %v239_v10 }
 0x120   :  { %v500_v13 = vpop.eup %499  ;;  %v278_v14 = vmul.f32 1.442695, %v723_v11  ;;  %v286_v15 = vmul.f32 1.442695, %v725_v12 }
 0x121   :  { %v502_v16 = vpop.eup %501  ;;  %302 = vadd.xlane.f32.xlu2 %v500_v13 }
 0x122   :  { %503 = vpow2.f32 %v278_v14  ;;  %294 = vadd.xlane.f32.xlu1 %v502_v16 }
 0x123   :  { %505 = vpow2.f32 %v286_v15 }
 0x125   :  { %v225_v17 = vpop.xlane.xlu2 %224  ;;  %v219_v18 = vpop.xlane.xlu1 %218 }
 0x126   :  { %v729_v19 = vsub.f32 %v203_v39, %v225_v17  ;;  %v217_v20 = vpop.xlane.xlu0 %216  ;;  %v735_v25 = vsub.f32 %v658_v40, %v219_v18 }
 0x127   :  { %v731_v21 = vsub.f32 %v199_v41, %v217_v20 }
 0x128   :  { %v504_v22 = vpop.eup %503  ;;  %v272_v23 = vmul.f32 1.442695, %v729_v19  ;;  %v266_v27 = vmul.f32 1.442695, %v735_v25 }
 0x129   :  { %v506_v24 = vpop.eup %505  ;;  %v264_v26 = vmul.f32 1.442695, %v731_v21  ;;  %310 = vadd.xlane.f32.xlu0 %v504_v22 }
 0x12a   :  { %507 = vpow2.f32 %v272_v23  ;;  %318 = vadd.xlane.f32.xlu1 %v506_v24 }
 0x12b   :  { %509 = vpow2.f32 %v264_v26 }
 0x12c   :  { %511 = vpow2.f32 %v266_v27 }
 0x12d   :  { %v235_v28 = vpop.xlane.xlu1 %234 }
 0x12e   :  { %v740_v29 = vsub.f32 %v667_v47, %v235_v28  ;;  %v233_v30 = vpop.xlane.xlu0 %232 }
 0x12f   :  { %v743_v31 = vsub.f32 %v672_v49, %v233_v30 }
 0x130   :  { %v508_v32 = vpop.eup %507  ;;  %v282_v33 = vmul.f32 1.442695, %v740_v29 }
 0x131   :  { %v280_v34 = vmul.f32 1.442695, %v743_v31  ;;  %304 = vadd.xlane.f32.xlu0 %v508_v32  ;;  %v510_v35 = vpop.eup %509 }
 0x132   :  { %513 = vpow2.f32 %v282_v33  ;;  %296 = vadd.xlane.f32.xlu2 %v510_v35  ;;  %v512_v40 = vpop.eup %511 }
 0x133   :  { %515 = vpow2.f32 %v280_v34 }
 0x134   :  { %v237_v36 = vpop.xlane.xlu2 %236 }
 0x135   :  { %v748_v37 = vsub.f32 %v680_v54, %v237_v36  ;;  %v221_v38 = vpop.xlane.xlu1 %220 }
 0x136   :  { %v227_v39 = vpop.xlane.xlu0 %226  ;;  %v756_v46 = vsub.f32 %v689_v56, %v221_v38 }
 0x137   :  { %v284_v41 = vmul.f32 1.442695, %v748_v37  ;;  %v752_v42 = vsub.f32 %v684_v55, %v227_v39 }
 0x138   :  { %v514_v43 = vpop.eup %513  ;;  %v268_v51 = vmul.f32 1.442695, %v756_v46 }
 0x139   :  { %v516_v44 = vpop.eup %515  ;;  %v274_v45 = vmul.f32 1.442695, %v752_v42  ;;  %298 = vadd.xlane.f32.xlu0 %v512_v40  ;;  %517 = vpow2.f32 %v284_v41 }
 0x13a   :  { %312 = vadd.xlane.f32.xlu1 %v516_v44  ;;  %314 = vadd.xlane.f32.xlu2 %v514_v43 }
 0x13b   :  { %519 = vpow2.f32 %v274_v45 }
 0x13c   :  { %v243_v47 = vpop.xlane.xlu2 %242 }
 0x13d   :  { %v759_v48 = vsub.f32 %v698_v62, %v243_v47  ;;  %v229_v49 = vpop.xlane.xlu1 %228 }
 0x13e   :  { %v762_v50 = vsub.f32 %v707_v0, %v229_v49  ;;  %v245_v55 = vpop.xlane.xlu0 %244 }
 0x13f   :  { %v290_v52 = vmul.f32 1.442695, %v759_v48  ;;  %v518_v53 = vpop.eup %517  ;;  %v768_v57 = vsub.f32 %v702_v63, %v245_v55 }
 0x140   :  { %v276_v54 = vmul.f32 1.442695, %v762_v50 }
 0x141   :  { %v520_v56 = vpop.eup %519  ;;  %521 = vpow2.f32 %v290_v52  ;;  %316 = vadd.xlane.f32.xlu0 %v518_v53  ;;  %v292_v61 = vmul.f32 1.442695, %v768_v57 }
 0x142   :  { %523 = vpow2.f32 %v276_v54  ;;  %306 = vadd.xlane.f32.xlu1 %v520_v56 }
 0x143   :  { %525 = vpow2.f32 %v268_v51 }
 0x145   :  { %v241_v58 = vpop.xlane.xlu1 %240 }
 0x146   :  { %v771_v59 = vsub.f32 %v714_v2, %v241_v58 }
 0x147   :  { %v522_v60 = vpop.eup %521 }
 0x148   :  { %v524_v62 = vpop.eup %523  ;;  %v288_v0 = vmul.f32 1.442695, %v771_v59 }
 0x149   :  { %v526_v1 = vpop.eup %525  ;;  %322 = vadd.xlane.f32.xlu0 %v522_v60  ;;  %308 = vadd.xlane.f32.xlu2 %v524_v62 }
 0x14a   :  { %527 = vpow2.f32 %v288_v0  ;;  %300 = vadd.xlane.f32.xlu1 %v526_v1 }
 0x14b   :  { %529 = vpow2.f32 %v292_v61 }
 0x150   :  { %v528_v3 = vpop.eup %527 }
 0x151   :  { %v530_v4 = vpop.eup %529  ;;  %320 = vadd.xlane.f32.xlu2 %v528_v3 }
 0x152   :  { %324 = vadd.xlane.f32.xlu1 %v530_v4 }
 0x194   :  { %v303_v63 = vpop.xlane.xlu2 %302 }
 0x195   :  { %531 = vlog2.f32 %v303_v63  ;;  %v295_v2 = vpop.xlane.xlu1 %294 }
 0x196   :  { %533 = vlog2.f32 %v295_v2 }
 0x19b   :  { %v532_v7 = vpop.eup %531 }
 0x19c   :  { %v534_v8 = vpop.eup %533  ;;  %v335_v9 = vmul.f32 0.6931472, %v532_v7  ;;  %v311_v10 = vpop.xlane.xlu0 %310 }
 0x19d   :  { %v327_v13 = vmul.f32 0.6931472, %v534_v8  ;;  %v319_v14 = vpop.xlane.xlu1 %318  ;;  %535 = vlog2.f32 %v311_v10 }
 0x19e   :  { %v362_v15 = vsub.f32 %v717_v5, %v335_v9  ;;  %537 = vlog2.f32 %v319_v14 }
 0x19f   :  { %v358_v16 = vsub.f32 %v719_v6, %v327_v13 }
 0x1a0   :  { %378 = vst [vmem:[%s842_s3 + $0x20] sm:$0xff] %v362_v15 }
 0x1a1   :  { %374 = vst [vmem:[%s842_s3] sm:$0xff] %v358_v16 }
 0x1a3   :  { %v536_v17 = vpop.eup %535 }
 0x1a4   :  { %v538_v18 = vpop.eup %537  ;;  %v343_v20 = vmul.f32 0.6931472, %v536_v17  ;;  %v305_v22 = vpop.xlane.xlu0 %304 }
 0x1a5   :  { %v351_v23 = vmul.f32 0.6931472, %v538_v18  ;;  %539 = vlog2.f32 %v305_v22  ;;  %v297_v5 = vpop.xlane.xlu2 %296 }
 0x1a6   :  { %v366_v24 = vsub.f32 %v723_v11, %v343_v20  ;;  %541 = vlog2.f32 %v297_v5 }
 0x1a7   :  { %v370_v26 = vsub.f32 %v725_v12, %v351_v23 }
 0x1a8   :  { %382 = vst [vmem:[%s842_s3 + $0x40] sm:$0xff] %v366_v24 }
 0x1a9   :  { %386 = vst [vmem:[%s842_s3 + $0x60] sm:$0xff] %v370_v26 }
 0x1ab   :  { %v540_v6 = vpop.eup %539 }
 0x1ac   :  { %v337_v27 = vmul.f32 0.6931472, %v540_v6  ;;  %v299_v28 = vpop.xlane.xlu0 %298  ;;  %v542_v30 = vpop.eup %541 }
 0x1ad   :  { %v313_v32 = vpop.xlane.xlu1 %312  ;;  %543 = vlog2.f32 %v299_v28  ;;  %v329_v33 = vmul.f32 0.6931472, %v542_v30  ;;  %v315_v34 = vpop.xlane.xlu2 %314 }
 0x1ae   :  { %v363_v11 = vsub.f32 %v729_v19, %v337_v27  ;;  %545 = vlog2.f32 %v313_v32 }
 0x1af   :  { %547 = vlog2.f32 %v315_v34  ;;  %v359_v12 = vsub.f32 %v731_v21, %v329_v33 }
 0x1b0   :  { %379 = vst [vmem:[%s842_s3 + $0x28] sm:$0xff] %v363_v11 }
 0x1b1   :  { %375 = vst [vmem:[%s842_s3 + $0x8] sm:$0xff] %v359_v12 }
 0x1b3   :  { %v544_v35 = vpop.eup %543 }
 0x1b4   :  { %v546_v36 = vpop.eup %545  ;;  %v331_v38 = vmul.f32 0.6931472, %v544_v35  ;;  %v317_v39 = vpop.xlane.xlu0 %316 }
 0x1b5   :  { %v548_v40 = vpop.eup %547  ;;  %v345_v41 = vmul.f32 0.6931472, %v546_v36  ;;  %v307_v19 = vpop.xlane.xlu1 %306  ;;  %549 = vlog2.f32 %v317_v39 }
 0x1b6   :  { %v347_v43 = vmul.f32 0.6931472, %v548_v40  ;;  %v360_v44 = vsub.f32 %v735_v25, %v331_v38  ;;  %551 = vlog2.f32 %v307_v19 }
 0x1b7   :  { %v367_v21 = vsub.f32 %v743_v31, %v345_v41 }
 0x1b8   :  { %v368_v45 = vsub.f32 %v740_v29, %v347_v43  ;;  %376 = vst [vmem:[%s842_s3 + $0x10] sm:$0xff] %v360_v44 }
 0x1b9   :  { %383 = vst [vmem:[%s842_s3 + $0x48] sm:$0xff] %v367_v21 }
 0x1ba   :  { %384 = vst [vmem:[%s842_s3 + $0x50] sm:$0xff] %v368_v45 }
 0x1bb   :  { %v550_v47 = vpop.eup %549 }
 0x1bc   :  { %v552_v49 = vpop.eup %551  ;;  %v349_v25 = vmul.f32 0.6931472, %v550_v47  ;;  %v309_v51 = vpop.xlane.xlu2 %308 }
 0x1bd   :  { %v323_v52 = vpop.xlane.xlu0 %322  ;;  %v339_v31 = vmul.f32 0.6931472, %v552_v49  ;;  %553 = vlog2.f32 %v309_v51  ;;  %v301_v29 = vpop.xlane.xlu1 %300 }
 0x1be   :  { %v369_v53 = vsub.f32 %v748_v37, %v349_v25  ;;  %555 = vlog2.f32 %v301_v29 }
 0x1bf   :  { %v364_v54 = vsub.f32 %v752_v42, %v339_v31  ;;  %557 = vlog2.f32 %v323_v52 }
 0x1c0   :  { %385 = vst [vmem:[%s842_s3 + $0x58] sm:$0xff] %v369_v53 }
 0x1c1   :  { %380 = vst [vmem:[%s842_s3 + $0x30] sm:$0xff] %v364_v54 }
 0x1c3   :  { %v554_v55 = vpop.eup %553 }
 0x1c4   :  { %v556_v56 = vpop.eup %555  ;;  %v341_v58 = vmul.f32 0.6931472, %v554_v55  ;;  %v321_v60 = vpop.xlane.xlu2 %320 }
 0x1c5   :  { %v558_v61 = vpop.eup %557  ;;  %v333_v62 = vmul.f32 0.6931472, %v556_v56  ;;  %559 = vlog2.f32 %v321_v60  ;;  %v325_v37 = vpop.xlane.xlu1 %324 }
 0x1c6   :  { %v365_v0 = vsub.f32 %v762_v50, %v341_v58  ;;  %v355_v42 = vmul.f32 0.6931472, %v558_v61  ;;  %561 = vlog2.f32 %v325_v37 }
 0x1c7   :  { %v361_v1 = vsub.f32 %v756_v46, %v333_v62 }
 0x1c8   :  { %381 = vst [vmem:[%s842_s3 + $0x38] sm:$0xff] %v365_v0  ;;  %v372_v3 = vsub.f32 %v759_v48, %v355_v42 }
 0x1c9   :  { %377 = vst [vmem:[%s842_s3 + $0x18] sm:$0xff] %v361_v1 }
 0x1ca   :  { %388 = vst [vmem:[%s842_s3 + $0x70] sm:$0xff] %v372_v3 }
 0x1cb   :  { %v560_v4 = vpop.eup %559 }
 0x1cc   :  { %v562_v50 = vpop.eup %561  ;;  %v353_v63 = vmul.f32 0.6931472, %v560_v4 }
 0x1cd   :  { %v357_v2 = vmul.f32 0.6931472, %v562_v50 }
 0x1ce   :  { %v371_v46 = vsub.f32 %v771_v59, %v353_v63 }
 0x1cf   :  { %v373_v7 = vsub.f32 %v768_v57, %v357_v2 }
 0x1d0   :  { %387 = vst [vmem:[%s842_s3 + $0x68] sm:$0xff] %v371_v46 }
 0x1d1   :  { %389 = vst [vmem:[%s842_s3 + $0x78] sm:$0xff] %v373_v7 }

</bundles_post_ra>
